<compile_context>
chip_gen: v5e
topology: v5e:2x2
jax: 0.10.0
libtpu: 0.0.40
codegen_flags: <defaults>
</compile_context>

<pallas_src>
import functools
import math

import numpy as np

import jax
import jax.numpy as jnp
from jax.experimental import pallas as pl
from jax.experimental.pallas import tpu as pltpu

# Columns (of the out_features axis) that receive ELU(x) + 1 + 1e-6,
# exactly as in the PyTorch forward (indices 0,1,2,4,8,9).
_ELU_COLS = (0, 1, 2, 4, 8, 9)
_HIDDEN = 256  # fixed by the module definition


def _round_up(a, b):
    return (a + b - 1) // b * b


def _cdiv(a, b):
    return (a + b - 1) // b


# ---------------------------------------------------------------------------
# Kernel
# ---------------------------------------------------------------------------
def _mdn_kernel(x_ref, w1_ref, b1_ref, w2_ref, b2_ref,
                pi_mask_ref, elu_mask_ref, out_ref):
    n_lo = pi_mask_ref.shape[-1]     # static: lanes that need post-processing
    n_out = out_ref.shape[-1]

    # Two wide MXU matmuls, f32 accumulation.
    x = x_ref[...]
    h = jnp.dot(x, w1_ref[...], preferred_element_type=jnp.float32) + b1_ref[...]
    h = jnp.maximum(h, 0.0).astype(w2_ref.dtype)                      # ReLU
    out = jnp.dot(h, w2_ref[...], preferred_element_type=jnp.float32) + b2_ref[...]
    # out: (TB, NP) f32 fused slab = [pi logits/T | sigma raw | mu | zero pad]

    # --- post-process only the first n_lo lanes (pi + sigma columns) ---
    lo = out[:, :n_lo]
    pi_m = pi_mask_ref[...] > 0.5     # (1, n_lo) bool, broadcasts over rows
    elu_m = elu_mask_ref[...] > 0.5   # (1, n_lo) bool

    # masked softmax max over the pi columns (1/T already folded into W2/b2)
    m = jnp.max(jnp.where(pi_m, lo, -jnp.inf), axis=1, keepdims=True)  # (TB,1)
    # ONE exp serves both: softmax numerators (pi cols, shifted by m) and the
    # ELU negative branch (other cols, shift 0 -> exp(lo)).
    shift = jnp.where(pi_m, m, 0.0)
    e = jnp.exp(lo - shift)
    s = jnp.sum(jnp.where(pi_m, e, 0.0), axis=1, keepdims=True)        # (TB,1)
    pi_vals = e * pl.reciprocal(s, approx=True)

    # ELU(x) + 1 + 1e-6:  x > 0 -> x + 1 + 1e-6 ;  x <= 0 -> exp(x) + 1e-6
    # (e == exp(lo) on non-pi columns; any inf on large discarded lanes is
    #  removed by the selects below, no NaN can be produced).
    elu_vals = jnp.where(lo > 0, lo + (1.0 + 1e-6), e + 1e-6)

    lo_out = jnp.where(pi_m, pi_vals, jnp.where(elu_m, elu_vals, lo))

    # Two static, lane-aligned (multiple-of-128) stores; bf16 writeback.
    out_ref[:, :n_lo] = lo_out.astype(out_ref.dtype)
    if n_lo < n_out:
        out_ref[:, n_lo:] = out[:, n_lo:].astype(out_ref.dtype)


# ---------------------------------------------------------------------------
# Parameter packing (done once, outside the kernel)
# ---------------------------------------------------------------------------
def pack_mdn_params(params, *, num_gaussians, out_features, temperature=1.0,
                    hidden=_HIDDEN, matmul_dtype=jnp.bfloat16):
    """Fuse the 3 heads into one wide layer-1 and a block-diagonal layer-2."""
    K, G = num_gaussians, out_features
    KG = K * G
    n_raw = K + 2 * KG
    n_pad = max(128, _round_up(n_raw, 128))
    # All pi and ELU(sigma) columns live below K + KG; only that (lane-rounded)
    # prefix needs post-processing in the kernel.
    n_lo = min(n_pad, _round_up(K + KG, 128))
    inv_t = 1.0 / float(temperature)

    w1 = jnp.concatenate(
        [params["pi"]["w1"], params["sigma"]["w1"], params["mu"]["w1"]], axis=1)
    b1 = jnp.concatenate(
        [params["pi"]["b1"], params["sigma"]["b1"], params["mu"]["b1"]], axis=1)

    w2 = jnp.zeros((3 * hidden, n_pad), jnp.float32)
    w2 = w2.at[0:hidden, 0:K].set(params["pi"]["w2"] * inv_t)
    w2 = w2.at[hidden:2 * hidden, K:K + KG].set(params["sigma"]["w2"])
    w2 = w2.at[2 * hidden:3 * hidden, K + KG:K + 2 * KG].set(params["mu"]["w2"])

    b2 = jnp.zeros((1, n_pad), jnp.float32)
    b2 = b2.at[:, 0:K].set(params["pi"]["b2"] * inv_t)
    b2 = b2.at[:, K:K + KG].set(params["sigma"]["b2"])
    b2 = b2.at[:, K + KG:K + 2 * KG].set(params["mu"]["b2"])

    # Trace-time constant masks over the post-processed prefix only.
    pi_mask = np.zeros((1, n_lo), np.float32)
    pi_mask[0, :K] = 1.0
    elu_mask = np.zeros((1, n_lo), np.float32)
    for k in range(K):
        for c in _ELU_COLS:
            elu_mask[0, K + k * G + c] = 1.0

    return {
        "w1": w1.astype(matmul_dtype),
        "b1": b1.astype(jnp.float32),
        "w2": w2.astype(matmul_dtype),
        "b2": b2,
        "pi_mask": jnp.asarray(pi_mask),
        "elu_mask": jnp.asarray(elu_mask),
        "n_pad": n_pad,
        "n_lo": n_lo,
    }


# ---------------------------------------------------------------------------
# Forward wrapper
# ---------------------------------------------------------------------------
def mdn_forward(x, packed, *, num_gaussians, out_features, block_rows=1024,
                out_dtype=jnp.bfloat16):
    """x: (B, in_features). Returns (pi, sigma, mu) like the PyTorch module."""
    B, D = x.shape
    K, G = num_gaussians, out_features
    KG = K * G
    H3 = packed["w1"].shape[1]       # 3 * 256
    NP = packed["w2"].shape[1]       # padded fused output width (mult of 128)
    n_lo = packed["pi_mask"].shape[1]

    # Batch tile: multiple of 16 (covers f32 and bf16 sublane packing).
    tb = min(int(block_rows), _round_up(B, 16))
    tb = max(16, _round_up(tb, 16))
    # Ensure >= 2 grid steps for large batches so the "parallel" batch axis can
    # actually split across v7x's two TensorCores.
    if B >= 512:
        tb = min(tb, max(256, _round_up(_cdiv(B, 2), 16)))
    Bp = _round_up(B, tb)

    xd = x.astype(packed["w1"].dtype)
    if Bp != B:
        xd = jnp.pad(xd, ((0, Bp - B), (0, 0)))

    grid = (pl.cdiv(Bp, tb),)

    out = pl.pallas_call(
        _mdn_kernel,
        out_shape=jax.ShapeDtypeStruct((Bp, NP), out_dtype),
        grid_spec=pltpu.PrefetchScalarGridSpec(
            num_scalar_prefetch=0,
            grid=grid,
            in_specs=[
                pl.BlockSpec((tb, D), lambda i: (i, 0)),    # x tile (pipelined)
                pl.BlockSpec((D, H3), lambda i: (0, 0)),    # W1cat (resident)
                pl.BlockSpec((1, H3), lambda i: (0, 0)),    # b1cat
                pl.BlockSpec((H3, NP), lambda i: (0, 0)),   # W2cat (block-diag)
                pl.BlockSpec((1, NP), lambda i: (0, 0)),    # b2cat
                pl.BlockSpec((1, n_lo), lambda i: (0, 0)),  # pi column mask
                pl.BlockSpec((1, n_lo), lambda i: (0, 0)),  # elu column mask
            ],
            out_specs=pl.BlockSpec((tb, NP), lambda i: (i, 0)),
        ),
        compiler_params=pltpu.CompilerParams(
            dimension_semantics=("parallel",),
            vmem_limit_bytes=32 * 1024 * 1024,
        ),
    )(xd, packed["w1"], packed["b1"], packed["w2"], packed["b2"],
      packed["pi_mask"], packed["elu_mask"])

    out = out[:B].astype(jnp.float32)
    pi = out[:, :K]
    sigma = out[:, K:K + KG].reshape(B, K, G)
    mu = out[:, K + KG:K + 2 * KG].reshape(B, K, G)
    return pi, sigma, mu


# ---------------------------------------------------------------------------
# Init (mimics nn.Linear's U(-1/sqrt(fan_in), 1/sqrt(fan_in))) + JAX reference
# ---------------------------------------------------------------------------
def init_mdn_params(key, in_features, out_features, num_gaussians, hidden=_HIDDEN):
    def linear(key, fan_in, fan_out):
        kw, kb = jax.random.split(key)
        bound = 1.0 / math.sqrt(fan_in)
        w = jax.random.uniform(kw, (fan_in, fan_out), jnp.float32, -bound, bound)
        b = jax.random.uniform(kb, (1, fan_out), jnp.float32, -bound, bound)
        return w, b

    keys = jax.random.split(key, 6)
    head_out = {"pi": num_gaussians,
                "sigma": out_features * num_gaussians,
                "mu": out_features * num_gaussians}
    params = {}
    for i, name in enumerate(("pi", "sigma", "mu")):
        w1, b1 = linear(keys[2 * i], in_features, hidden)
        w2, b2 = linear(keys[2 * i + 1], hidden, head_out[name])
        params[name] = {"w1": w1, "b1": b1, "w2": w2, "b2": b2}
    return params


def mdn_reference(x, params, *, num_gaussians, out_features, temperature=1.0):
    """Pure-JAX f32 reference matching the PyTorch forward."""
    def head(p):
        h = jnp.maximum(x @ p["w1"] + p["b1"], 0.0)
        return h @ p["w2"] + p["b2"]

    logits = head(params["pi"]) / temperature
    pi = jax.nn.softmax(logits, axis=1)
    sig = head(params["sigma"]).reshape(-1, num_gaussians, out_features)
    elu = jnp.where(sig > 0, sig, jnp.exp(sig) - 1.0)
    col_mask = jnp.zeros((out_features,), bool).at[jnp.array(_ELU_COLS)].set(True)
    sig = jnp.where(col_mask[None, None, :], elu + 1.0 + 1e-6, sig)
    mu = head(params["mu"]).reshape(-1, num_gaussians, out_features)
    return pi, sig, mu


if __name__ == "__main__":
    # Small shapes consistent with the module: out_features >= 10 because the
    # forward indexes sigma[:, :, 9].
    B, IN_FEATURES, OUT_FEATURES, NUM_GAUSSIANS = 32, 32, 10, 8
    TEMPERATURE = 1.0

    key = jax.random.PRNGKey(0)
    k_x, k_p = jax.random.split(key)
    x = jax.random.normal(k_x, (B, IN_FEATURES), dtype=jnp.float32)
    params = init_mdn_params(k_p, IN_FEATURES, OUT_FEATURES, NUM_GAUSSIANS)

    packed = pack_mdn_params(
        params, num_gaussians=NUM_GAUSSIANS, out_features=OUT_FEATURES,
        temperature=TEMPERATURE, matmul_dtype=jnp.bfloat16)

    fwd = functools.partial(
        mdn_forward, num_gaussians=NUM_GAUSSIANS, out_features=OUT_FEATURES,
        block_rows=16)  # small tile so the demo exercises a 2-step batch grid

    pi, sigma, mu = fwd(x, packed)
    jax.block_until_ready((pi, sigma, mu))

    assert pi.shape == (B, NUM_GAUSSIANS)
    assert sigma.shape == (B, NUM_GAUSSIANS, OUT_FEATURES)
    assert mu.shape == (B, NUM_GAUSSIANS, OUT_FEATURES)

    # Correctness vs f32 reference (loose tolerance: bf16 matmul operands,
    # bf16 output slab, approx reciprocal in the softmax denominator).
    pi_r, sigma_r, mu_r = mdn_reference(
        x, params, num_gaussians=NUM_GAUSSIANS, out_features=OUT_FEATURES,
        temperature=TEMPERATURE)
    assert jnp.allclose(pi, pi_r, atol=3e-2, rtol=3e-2)
    assert jnp.allclose(sigma, sigma_r, atol=3e-2, rtol=3e-2)
    assert jnp.allclose(mu, mu_r, atol=3e-2, rtol=3e-2)
    # pi rows should still be (approximately) normalized.
    assert jnp.allclose(pi.sum(axis=1), 1.0, atol=1e-2)

    print("KERNEL_OK")
</pallas_src>

<mosaic_0001>
module attributes {stable_mosaic.version = 11 : i64} {
  func.func @_mdn_kernel(%arg0: i32, %arg1: memref<16x32xbf16, #tpu.memory_space<vmem>>, %arg2: memref<32x768xbf16, #tpu.memory_space<vmem>>, %arg3: memref<1x768xf32, #tpu.memory_space<vmem>>, %arg4: memref<768x256xbf16, #tpu.memory_space<vmem>>, %arg5: memref<1x256xf32, #tpu.memory_space<vmem>>, %arg6: memref<1x128xf32, #tpu.memory_space<vmem>>, %arg7: memref<1x128xf32, #tpu.memory_space<vmem>>, %arg8: memref<16x256xbf16, #tpu.memory_space<vmem>>) attributes {dimension_semantics = [#tpu.dimension_semantics<parallel>], iteration_bounds = array<i64: 2>, scalar_prefetch = 0 : i64, scratch_operands = 0 : i64, tpu.core_type = #tpu.core_type<tc>, window_params = [{transform_indices = @transform_0, window_bounds = array<i64: 16, 32>}, {pipeline_mode = #tpu.pipeline_mode<synchronous>, transform_indices = @transform_1, window_bounds = array<i64: 32, 768>}, {pipeline_mode = #tpu.pipeline_mode<synchronous>, transform_indices = @transform_2, window_bounds = array<i64: 1, 768>}, {pipeline_mode = #tpu.pipeline_mode<synchronous>, transform_indices = @transform_3, window_bounds = array<i64: 768, 256>}, {pipeline_mode = #tpu.pipeline_mode<synchronous>, transform_indices = @transform_4, window_bounds = array<i64: 1, 256>}, {pipeline_mode = #tpu.pipeline_mode<synchronous>, transform_indices = @transform_5, window_bounds = array<i64: 1, 128>}, {pipeline_mode = #tpu.pipeline_mode<synchronous>, transform_indices = @transform_6, window_bounds = array<i64: 1, 128>}, {transform_indices = @transform_7, window_bounds = array<i64: 16, 256>}]} {
    %c0 = arith.constant 0 : index
    %c0_0 = arith.constant 0 : index
    %0 = vector.load %arg1[%c0, %c0_0] : memref<16x32xbf16, #tpu.memory_space<vmem>>, vector<16x32xbf16>
    %c0_1 = arith.constant 0 : index
    %c0_2 = arith.constant 0 : index
    %1 = vector.load %arg2[%c0_1, %c0_2] : memref<32x768xbf16, #tpu.memory_space<vmem>>, vector<32x768xbf16>
    %cst = arith.constant dense<0.000000e+00> : vector<16x768xf32>
    %2 = tpu.matmul %0, %1, %cst {dimension_numbers = #tpu.dot_dimension_numbers<[1], [0], [0], [1], [0, 0, 1, 1], [], []>} : vector<16x32xbf16>, vector<32x768xbf16>, vector<16x768xf32> -> vector<16x768xf32>
    %c0_3 = arith.constant 0 : index
    %c0_4 = arith.constant 0 : index
    %3 = vector.load %arg3[%c0_3, %c0_4] : memref<1x768xf32, #tpu.memory_space<vmem>>, vector<1x768xf32>
    %4 = vector.broadcast %3 : vector<1x768xf32> to vector<16x768xf32>
    %5 = arith.addf %2, %4 : vector<16x768xf32>
    %cst_5 = arith.constant 0.000000e+00 : f32
    %6 = vector.broadcast %cst_5 : f32 to vector<16x768xf32>
    %7 = arith.maximumf %5, %6 : vector<16x768xf32>
    %8 = arith.truncf %7 : vector<16x768xf32> to vector<16x768xbf16>
    %c0_6 = arith.constant 0 : index
    %c0_7 = arith.constant 0 : index
    %9 = vector.load %arg4[%c0_6, %c0_7] : memref<768x256xbf16, #tpu.memory_space<vmem>>, vector<768x256xbf16>
    %cst_8 = arith.constant dense<0.000000e+00> : vector<16x256xf32>
    %10 = tpu.matmul %8, %9, %cst_8 {dimension_numbers = #tpu.dot_dimension_numbers<[1], [0], [0], [1], [0, 0, 1, 1], [], []>} : vector<16x768xbf16>, vector<768x256xbf16>, vector<16x256xf32> -> vector<16x256xf32>
    %c0_9 = arith.constant 0 : index
    %c0_10 = arith.constant 0 : index
    %11 = vector.load %arg5[%c0_9, %c0_10] : memref<1x256xf32, #tpu.memory_space<vmem>>, vector<1x256xf32>
    %12 = vector.broadcast %11 : vector<1x256xf32> to vector<16x256xf32>
    %13 = arith.addf %10, %12 : vector<16x256xf32>
    %14 = vector.extract_strided_slice %13 {offsets = [0, 0], sizes = [16, 128], strides = [1, 1]} : vector<16x256xf32> to vector<16x128xf32>
    %c0_11 = arith.constant 0 : index
    %c0_12 = arith.constant 0 : index
    %15 = vector.load %arg6[%c0_11, %c0_12] : memref<1x128xf32, #tpu.memory_space<vmem>>, vector<1x128xf32>
    %cst_13 = arith.constant 5.000000e-01 : f32
    %16 = vector.broadcast %cst_13 : f32 to vector<1x128xf32>
    %17 = arith.cmpf ogt, %15, %16 : vector<1x128xf32>
    %c0_14 = arith.constant 0 : index
    %c0_15 = arith.constant 0 : index
    %18 = vector.load %arg7[%c0_14, %c0_15] : memref<1x128xf32, #tpu.memory_space<vmem>>, vector<1x128xf32>
    %cst_16 = arith.constant 5.000000e-01 : f32
    %19 = vector.broadcast %cst_16 : f32 to vector<1x128xf32>
    %20 = arith.cmpf ogt, %18, %19 : vector<1x128xf32>
    %cst_17 = arith.constant 0xFF800000 : f32
    %21 = vector.shape_cast %17 : vector<1x128xi1> to vector<1x128xi1>
    %22 = vector.broadcast %21 : vector<1x128xi1> to vector<16x128xi1>
    %23 = vector.broadcast %cst_17 : f32 to vector<16x128xf32>
    %24 = arith.select %22, %14, %23 : vector<16x128xi1>, vector<16x128xf32>
    %cst_18 = arith.constant dense<0xFF800000> : vector<16xf32>
    %25 = vector.multi_reduction <maximumf>, %24, %cst_18 [1] : vector<16x128xf32> to vector<16xf32>
    %26 = vector.shape_cast %25 : vector<16xf32> to vector<16x1xf32>
    %cst_19 = arith.constant 0.000000e+00 : f32
    %27 = vector.shape_cast %17 : vector<1x128xi1> to vector<1x128xi1>
    %28 = vector.broadcast %27 : vector<1x128xi1> to vector<16x128xi1>
    %29 = vector.shape_cast %26 : vector<16x1xf32> to vector<16x1xf32>
    %30 = vector.broadcast %29 : vector<16x1xf32> to vector<16x128xf32>
    %31 = vector.broadcast %cst_19 : f32 to vector<16x128xf32>
    %32 = arith.select %28, %30, %31 : vector<16x128xi1>, vector<16x128xf32>
    %33 = arith.subf %14, %32 : vector<16x128xf32>
    %34 = math.exp %33 : vector<16x128xf32>
    %cst_20 = arith.constant 0.000000e+00 : f32
    %35 = vector.shape_cast %17 : vector<1x128xi1> to vector<1x128xi1>
    %36 = vector.broadcast %35 : vector<1x128xi1> to vector<16x128xi1>
    %37 = vector.broadcast %cst_20 : f32 to vector<16x128xf32>
    %38 = arith.select %36, %34, %37 : vector<16x128xi1>, vector<16x128xf32>
    %cst_21 = arith.constant dense<0.000000e+00> : vector<16xf32>
    %39 = vector.multi_reduction <add>, %38, %cst_21 [1] : vector<16x128xf32> to vector<16xf32>
    %40 = vector.shape_cast %39 : vector<16xf32> to vector<16x1xf32>
    %41 = tpu.reciprocal %40 {approx = true} : vector<16x1xf32> -> vector<16x1xf32>
    %42 = vector.broadcast %41 : vector<16x1xf32> to vector<16x128xf32>
    %43 = arith.mulf %34, %42 : vector<16x128xf32>
    %cst_22 = arith.constant 0.000000e+00 : f32
    %44 = vector.broadcast %cst_22 : f32 to vector<16x128xf32>
    %45 = arith.cmpf ogt, %14, %44 : vector<16x128xf32>
    %cst_23 = arith.constant 1.00000095 : f32
    %46 = vector.broadcast %cst_23 : f32 to vector<16x128xf32>
    %47 = arith.addf %14, %46 : vector<16x128xf32>
    %cst_24 = arith.constant 9.99999997E-7 : f32
    %48 = vector.broadcast %cst_24 : f32 to vector<16x128xf32>
    %49 = arith.addf %34, %48 : vector<16x128xf32>
    %50 = arith.select %45, %47, %49 : vector<16x128xi1>, vector<16x128xf32>
    %51 = vector.shape_cast %20 : vector<1x128xi1> to vector<1x128xi1>
    %52 = vector.broadcast %51 : vector<1x128xi1> to vector<16x128xi1>
    %53 = arith.select %52, %50, %14 : vector<16x128xi1>, vector<16x128xf32>
    %54 = vector.shape_cast %17 : vector<1x128xi1> to vector<1x128xi1>
    %55 = vector.broadcast %54 : vector<1x128xi1> to vector<16x128xi1>
    %56 = arith.select %55, %43, %53 : vector<16x128xi1>, vector<16x128xf32>
    %57 = arith.truncf %56 : vector<16x128xf32> to vector<16x128xbf16>
    %c0_25 = arith.constant 0 : index
    %c0_26 = arith.constant 0 : index
    %58 = vector.load %arg8[%c0_25, %c0_26] : memref<16x256xbf16, #tpu.memory_space<vmem>>, vector<16x128xbf16>
    tpu.vector_store %arg8[%c0_25, %c0_26], %57 {strides = array<i32>} : memref<16x256xbf16, #tpu.memory_space<vmem>>, vector<16x128xbf16>,
    %59 = vector.extract_strided_slice %13 {offsets = [0, 128], sizes = [16, 128], strides = [1, 1]} : vector<16x256xf32> to vector<16x128xf32>
    %60 = arith.truncf %59 : vector<16x128xf32> to vector<16x128xbf16>
    %c0_27 = arith.constant 0 : index
    %c128 = arith.constant 128 : index
    %61 = vector.load %arg8[%c0_27, %c128] : memref<16x256xbf16, #tpu.memory_space<vmem>>, vector<16x128xbf16>
    tpu.vector_store %arg8[%c0_27, %c128], %60 {strides = array<i32>} : memref<16x256xbf16, #tpu.memory_space<vmem>>, vector<16x128xbf16>,
    return
  }
  func.func @transform_0(%arg0: i32) -> (i32, i32) {
    %c0_i32 = arith.constant 0 : i32
    %c0_i32_0 = arith.constant 0 : i32
    return %arg0, %c0_i32 : i32, i32
  }
  func.func @transform_1(%arg0: i32) -> (i32, i32) {
    %c0_i32 = arith.constant 0 : i32
    %c0_i32_0 = arith.constant 0 : i32
    %c0_i32_1 = arith.constant 0 : i32
    return %c0_i32, %c0_i32_0 : i32, i32
  }
  func.func @transform_2(%arg0: i32) -> (i32, i32) {
    %c0_i32 = arith.constant 0 : i32
    %c0_i32_0 = arith.constant 0 : i32
    %c0_i32_1 = arith.constant 0 : i32
    return %c0_i32, %c0_i32_0 : i32, i32
  }
  func.func @transform_3(%arg0: i32) -> (i32, i32) {
    %c0_i32 = arith.constant 0 : i32
    %c0_i32_0 = arith.constant 0 : i32
    %c0_i32_1 = arith.constant 0 : i32
    return %c0_i32, %c0_i32_0 : i32, i32
  }
  func.func @transform_4(%arg0: i32) -> (i32, i32) {
    %c0_i32 = arith.constant 0 : i32
    %c0_i32_0 = arith.constant 0 : i32
    %c0_i32_1 = arith.constant 0 : i32
    return %c0_i32, %c0_i32_0 : i32, i32
  }
  func.func @transform_5(%arg0: i32) -> (i32, i32) {
    %c0_i32 = arith.constant 0 : i32
    %c0_i32_0 = arith.constant 0 : i32
    %c0_i32_1 = arith.constant 0 : i32
    return %c0_i32, %c0_i32_0 : i32, i32
  }
  func.func @transform_6(%arg0: i32) -> (i32, i32) {
    %c0_i32 = arith.constant 0 : i32
    %c0_i32_0 = arith.constant 0 : i32
    %c0_i32_1 = arith.constant 0 : i32
    return %c0_i32, %c0_i32_0 : i32, i32
  }
  func.func @transform_7(%arg0: i32) -> (i32, i32) {
    %c0_i32 = arith.constant 0 : i32
    %c0_i32_0 = arith.constant 0 : i32
    return %arg0, %c0_i32 : i32, i32
  }
}

</mosaic_0001>

<bundles_post_ra>
// kernel: tpu_custom_call.1
= control target key start
LH: loop header
LB: loop body
LE: loop exit
PB: predicated region body
PF: predicated region fallthrough
CT: control target
= control target key end

     0   :  { %s2665_s0 = inlined_call_operand.hbm [shape: bf16[32,32], index: 0, kind: input, shape index: {}]   ;;  %s2666_s1 = inlined_call_operand.hbm [shape: bf16[32,768], index: 1, kind: input, shape index: {}]   ;;  %s2667_s2 = inlined_call_operand.hbm [shape: f32[1,768], index: 2, kind: input, shape index: {}]   ;;  %s2668_s3 = inlined_call_operand.hbm [shape: bf16[768,256], index: 3, kind: input, shape index: {}]   ;;  %s2669_s4 = inlined_call_operand.vmem [shape: f32[1,256], index: 4, kind: input, shape index: {}]   ;;  %s2670_s5 = inlined_call_operand.vmem [shape: f32[1,128], index: 5, kind: input, shape index: {}]   ;;  %s2671_s6 = inlined_call_operand.vmem [shape: f32[1,128], index: 6, kind: input, shape index: {}]   ;;  %s2672_s7 = inlined_call_operand.hbm [shape: bf16[32,256], index: 7, kind: output, shape index: {}]  }
   0x1   :  { %2673 = sst [smem:[#allocation15_spill]] %s2666_s1 }
   0x2   :  { %12 = vsyncpa [#allocation3], 0 }
   0x3   :  { %14 = vsyncpa [#allocation3 + $0x1], 0 }
   0x4   :  { %15 = vsyncpa [#allocation6], 0 }
   0x5   :  { %16 = vsyncpa [#allocation9], 0 }
   0x6   :  { %17 = vsyncpa [#allocation4], 0 }
   0x7   :  { %19 = vsyncpa [#allocation4 + $0x1], 0  ;;  %s2400_s24 = smov 0   ;;  %s2402_s25 = smov 0  }
   0x8   :  { %s2404_s26 = smov 0   ;;  %s2406_s27 = smov 0  }
   0x9 LB: > { %s2421_s28 = sadd.s32 4294967295, %s2346_s27   ;;  %s1472_s29 = sadd.s32 4294967294, %s2346_s27   ;;  %s2346_s27 = sphi %s2406_s27, %s2689_s27   ;;  %s2342_s26 = sphi %s2404_s26, %s2688_s26   ;;  %s2338_s25 = sphi %s2402_s25, %s2687_s25   ;;  %s2334_s24 = sphi %s2400_s24, %s2686_s24  }
   0xa   : > { %p45_p0 = scmp.ne.s32.totalorder %s2338_s25, %s2334_s24  ;;  %p46_p1 = scmp.eq.s32.totalorder %s2421_s28, 0 }
   0xb   : > { %p195_p2 = scmp.eq.s32.totalorder %s2421_s28, 1  ;;  %p201_p3 = scmp.eq.s32.totalorder %s1472_s29, 1 }
   0xc   : > { %p2430_p4 = por %p46_p1, %p45_p0  ;;  %p1473_p5 = scmp.ge.s32.totalorder %s2346_s27, 1 }
   0xd   : > { %p2435_p6 = por %p201_p3, %p45_p0  ;;  %p208_p7 = scmp.lt.s32.totalorder %s2346_s27, 3 }
   0xe   : > { %s2676_s1 = sld [smem:[#allocation15_spill]]  ;;  %s2348_s13 = smov [#allocation5]  }
   0xf   : > { %p2443_p8 = pnand %p1473_p5, %p208_p7  ;;  %s221_s14 = sshll.u32 %s2348_s13, 4  ;;  %s222_s14 = int_to_ptr.vmem [resolvable:$true] %s221_s14 }
  0x10   : > { %s234_s18 = sshll.u32 %s2667_s2, 4  ;;  %s2349_s19 = smov 384   ;;  %s235_s18 = int_to_ptr.hbm [resolvable:$true] %s234_s18 }
  0x11   : > { %p2074_p9 = pneg %p2443_p8  ;;  %s2350_s20 = smov 24  }
  0x12   : > { %s2351_s21 = smov [#allocation7]   ;;  %s245_s9 = sshll.u32 %s2668_s3, 4  ;;  %s246_s9 = int_to_ptr.hbm [resolvable:$true] %s245_s9 }
  0x13   : > { %p2451_p10 = pnand %p2074_p9, %p46_p1  ;;  %s236_s22 = sshll.u32 %s2351_s21, 4  ;;  %s237_s22 = int_to_ptr.vmem [resolvable:$true] %s236_s22 }
  0x14   : > { %s219_s11 = sshll.u32 %s2676_s1, 4  ;;  %s2352_s10 = smov [#allocation8]   ;;  %s220_s11 = int_to_ptr.hbm [resolvable:$true] %s219_s11 }
  0x15   : > { %2077 = dma.hbm_to_vmem [thread:$0]  (!%p2451_p10), %s220_s11, 1536, %s222_s14, [#allocation6], %s2349_s19, %s2349_s19, %s2350_s20  }
  0x16   : > { %2080 = dma.hbm_to_vmem [thread:$0]  (!%p2451_p10), %s235_s18, 96, %s237_s22, [#allocation6]  }
  0x17   : > { %s247_s13 = sshll.u32 %s2352_s10, 4  ;;  %s2353_s11 = smov 128   ;;  %s248_s13 = int_to_ptr.vmem [resolvable:$true] %s247_s13 }
  0x18   : > { %s2354_s14 = smov 8   ;;  %s2469_s16 = sadd.s32 1, %s2346_s27  }
  0x19   : > { %2083 = dma.hbm_to_vmem [thread:$0]  (!%p2451_p10), %s246_s9, 12288, %s248_s13, [#allocation9], %s2353_s11, %s2353_s11, %s2354_s14  }
  0x1a   : > { %s29_s17 = ssub.s32 %s2346_s27, %s2469_s16  ;;  %s32_s19 = sadd.s32 1, %s2342_s26 }
  0x1b   : > { %p30_p12 = scmp.eq.s32.totalorder %s29_s17, 0  ;;  %p39_p13 = scmp.ne.s32.totalorder %s2342_s26, %s2338_s25 }
  0x1c   : > { %p40_p0 = scmp.eq.s32.totalorder %s2346_s27, 0  ;;  %p2095_p3 = scmp.lt.s32.totalorder %s2346_s27, 2 }
  0x1d   : > { %s2479_s18 = scalar_select %p30_p12, %s2342_s26, %s32_s19  }
  0x1e   : > { %p41_p5 = por %p40_p0, %p39_p13  ;;  %p2483_p7 = por %p195_p2, %p39_p13 }
  0x1f   : > { %s270_s15 = sand.u32 1, %s2342_s26   ;;  %s1935_s21 = sshll.u32 %s2346_s27, 3 }
  0x20   : > { %s1478_s22 = sshll.u32 %s270_s15, 3  ;;  %s279_s9 = scalar_lea.hbm %s2665_s0, %s1935_s21 }
  0x21   : > { %s280_s10 = sshll.u32 %s279_s9, 4  ;;  %s274_s13 = scalar_lea.vmem [#allocation2], %s1478_s22  ;;  %s281_s10 = int_to_ptr.hbm [resolvable:$true] %s280_s10 }
  0x22   : > { %s282_s11 = sshll.u32 %s274_s13, 4  ;;  %p2494_p9 = pnand %p2095_p3, %p41_p5  ;;  %s283_s11 = int_to_ptr.vmem [resolvable:$true] %s282_s11 }
  0x23   : > { %s271_s17 = scalar_lea.sflag [#allocation3], %s270_s15  ;;  %s2242_s19 = sshra.s32 %s281_s10, 4  ;;  %s2243_s19 = int_to_ptr.hbm [resolvable:$true] %s2242_s19 }
  0x24   : > { %s2244_s1 = scalar_lea.hbm %s2243_s19, 8  ;;  %p2246_p10 = pneg %p2494_p9 }
  0x25   : > { %p2245_p2 = scmp.ne.s32.totalorder %s2243_s19, %s2244_s1  ;;  %s2249_s23 = scalar_lea.hbm %s2665_s0, 16 }
  0x26   : > { %p2250_p0 = scmp.lt.s32.totalorder %s2243_s19, %s2665_s0  ;;  %p2251_p3 = scmp.lt.s32.totalorder %s2249_s23, %s2244_s1 }
  0x27   : > { %p2247_p12 = pnand %p2246_p10, %p2245_p2 }
  0x28   : > { %p2252_p5 = por %p2251_p3, %p2250_p0 }
  0x29   : > { %p2248_p13 = pneg %p2247_p12 }
  0x2b   : > { %p2253_p11 = pnand %p2252_p5, %p2248_p13 }
  0x2d   : > { %2256 = shalt.err (!%p2253_p11)
}
  0x2e   : > { %s2355_s15 = smov 64   ;;  %s2356_s13 = smov 4  }
  0x2f   : > { %2087 = dma.hbm_to_vmem [thread:$0]  (!%p2494_p9), %s281_s10, 128, %s283_s11, %s271_s17, %s2355_s15, %s2355_s15, %s2356_s13  }
  0x30   : > { %294 = sbr.rel (%p2443_p8) target bundleno = 630 (0x276), region = 48  ;;  %s2511_s21 = sand.u32 (!%p2443_p8), 1, %s2338_s25  }
  0x31   : > { %s1482_s22 = sshll.u32 (!%p2443_p8), %s2511_s21, 3  ;;  %s297_s19 = scalar_lea.sflag (!%p2443_p8), [#allocation3], %s2511_s21 }
  0x32   : > { %s2515_s1 = scalar_lea.vmem (!%p2443_p8), [#allocation2], %s1482_s22 }
  0x35   : > { %2317 = dma.done.wait (%p2430_p4), %s297_s19, 128  }
  0x36   : > { %2319 = vsyncadd (%p2430_p4), %s297_s19, 4294967168 }
  0x37   : > { %2321 = dma.done.wait (%p46_p1), [#allocation6], 1632  }
  0x38   : > { %2323 = vsyncadd (%p46_p1), [#allocation6], 4294965664 }
  0x39   : > { %2325 = dma.done.wait (%p46_p1), [#allocation9], 12288  }
  0x3a   : > { %2327 = vsyncadd (%p46_p1), [#allocation9], 4294955008  ;;  %v1517_v0 = vld [vmem:[#allocation5 + $0x30] sm:$0xf]  ;;  %v1946_v1 = vld [vmem:[#allocation5 + $0x44] sm:$0xf0] }
  0x3b   : > { %v1943_v2 = vld [vmem:[#allocation5 + $0x34] sm:$0xf]  ;;  %v1518_v3 = vor.u32 %v1946_v1, %v1517_v0  ;;  %v1519_v4 = vld [vmem:[#allocation5 + $0x48] sm:$0xf0]  ;;  %v1525_v5 = vld [vmem:[#allocation5 + $0x38] sm:$0xf] }
  0x3c   : > { %v1947_v6 = vld [vmem:[#allocation5 + $0x4c] sm:$0xf0]  ;;  %v1522_v7 = vor.u32 %v1943_v2, %v1519_v4  ;;  %v1944_v9 = vld [vmem:[#allocation5 + $0x3c] sm:$0xf]  ;;  %v1527_v10 = vld [vmem:[#allocation5 + $0x50] sm:$0xf0] }
  0x3d   : > { %v1526_v8 = vor.u32 %v1947_v6, %v1525_v5  ;;  %v1493_v11 = vld [vmem:[#allocation5] sm:$0xf]  ;;  %453 = vmatpush.bf16.msra.mxu0 %v1518_v3  ;;  %v1530_v12 = vor.u32 %v1944_v9, %v1527_v10  ;;  %v1940_v13 = vld [vmem:[#allocation5 + $0x14] sm:$0xf0]  ;;  %v1937_v14 = vld [vmem:[#allocation5 + $0x4] sm:$0xf] }
  0x3e   : > { %v1495_v15 = vld [vmem:[#allocation5 + $0x18] sm:$0xf0]  ;;  %467 = vmatpush.bf16.msra.mxu1 %v1522_v7  ;;  %v1494_v16 = vor.u32 %v1940_v13, %v1493_v11  ;;  %v1501_v18 = vld [vmem:[#allocation5 + $0x8] sm:$0xf]  ;;  %v1941_v19 = vld [vmem:[#allocation5 + $0x1c] sm:$0xf0] }
  0x3f   : > { %481 = vmatpush.bf16.msra.mxu2 %v1526_v8  ;;  %v1498_v17 = vor.u32 %v1937_v14, %v1495_v15  ;;  %v1938_v20 = vld [vmem:[#allocation5 + $0xc] sm:$0xf]  ;;  %495 = vmatpush.bf16.msra.mxu3 %v1530_v12  ;;  %v1502_v21 = vor.u32 %v1941_v19, %v1501_v18  ;;  %v1503_v22 = vld [vmem:[#allocation5 + $0x20] sm:$0xf0]  ;;  %v2530_v23 = vld [vmem:[%s2515_s1] sm:$0xff]  ;;  %vm443_vm0 = vcmask 261120  }
  0x40   : > { %v1533_v24 = vld [vmem:[#allocation5 + $0x40] sm:$0xf]  ;;  %v1506_v25 = vor.u32 %v1938_v20, %v1503_v22  ;;  %v1948_v26 = vld [vmem:[#allocation5 + $0x54] sm:$0xf0]  ;;  %v1945_v27 = vld [vmem:[#allocation5 + $0x44] sm:$0xf] }
  0x41   : > { %v1535_v28 = vld [vmem:[#allocation5 + $0x58] sm:$0xf0]  ;;  %454 = vmatpush.bf16.msra.mxu0 %v1494_v16  ;;  %v1534_v29 = vor.u32 %v1948_v26, %v1533_v24  ;;  %v1509_v31 = vld [vmem:[#allocation5 + $0x10] sm:$0xf]  ;;  %v1942_v32 = vld [vmem:[#allocation5 + $0x24] sm:$0xf0] }
  0x42   : > { %v1538_v30 = vor.u32 %v1945_v27, %v1535_v28  ;;  %v1939_v33 = vld [vmem:[#allocation5 + $0x14] sm:$0xf]  ;;  %468 = vmatpush.bf16.msra.mxu1 %v1498_v17  ;;  %v1511_v34 = vld [vmem:[#allocation5 + $0x28] sm:$0xf0]  ;;  %v1964_v36 = vld [vmem:[#allocation8 + $0x74] sm:$0xf0]  ;;  %v1510_v37 = vor.u32 %v1942_v32, %v1509_v31 }
  0x43   : > { %482 = vmatpush.bf16.msra.mxu2 %v1502_v21  ;;  %v1603_v35 = vld [vmem:[#allocation8 + $0x70] sm:$0xf]  ;;  %496 = vmatpush.bf16.msra.mxu3 %v1506_v25  ;;  %v1980_v40 = vld [vmem:[#allocation8 + $0xf4] sm:$0xf0]  ;;  %v1595_v41 = vld [vmem:[#allocation8 + $0x60] sm:$0xf]  ;;  %v1514_v42 = vor.u32 %v1939_v33, %v1511_v34 }
  0x44   : > { %v1604_v38 = vor.u32 %v1964_v36, %v1603_v35  ;;  %v1667_v39 = vld [vmem:[#allocation8 + $0xf0] sm:$0xf]  ;;  %1539 = vmatmul.msk.bf16.vlgmr.msra.gmra.mxu0 %vm443_vm0, %v2530_v23  ;;  %v1962_v44 = vld [vmem:[#allocation8 + $0x64] sm:$0xf0]  ;;  %v1659_v45 = vld [vmem:[#allocation8 + $0xe0] sm:$0xf] }
  0x45   : > { %509 = vmatpush.bf16.msrb.mxu0 %v1534_v29  ;;  %v1668_v43 = vor.u32 %v1980_v40, %v1667_v39  ;;  %v1978_v46 = vld [vmem:[#allocation8 + $0xe4] sm:$0xf0]  ;;  %1540 = vmatmul.msk.bf16.vlgmr.msra.gmra.mxu1 %vm443_vm0, %v2530_v23  ;;  %v1731_v47 = vld [vmem:[#allocation8 + $0x170] sm:$0xf]  ;;  %v1996_v48 = vld [vmem:[#allocation8 + $0x174] sm:$0xf0]  ;;  %v1596_v50 = vor.u32 %v1962_v44, %v1595_v41 }
  0x46   : > { %523 = vmatpush.bf16.msrb.mxu1 %v1538_v30  ;;  %1541 = vmatmul.msk.bf16.vlgmr.msra.gmra.mxu2 %vm443_vm0, %v2530_v23  ;;  %v1795_v49 = vld [vmem:[#allocation8 + $0x1f0] sm:$0xf]  ;;  %v1732_v51 = vor.u32 %v1996_v48, %v1731_v47  ;;  %v2012_v52 = vld [vmem:[#allocation8 + $0x1f4] sm:$0xf0]  ;;  %v1660_v55 = vor.u32 %v1978_v46, %v1659_v45  ;;  %v1723_v59 = vld [vmem:[#allocation8 + $0x160] sm:$0xf] }
  0x47   : > { %1542 = vmatmul.msk.bf16.vlgmr.msra.gmra.mxu3 %vm443_vm0, %v2530_v23  ;;  %1131 = vmatpush.bf16.msrb.mxu2 %v1604_v38  ;;  %v1587_v53 = vld [vmem:[#allocation8 + $0x50] sm:$0xf]  ;;  %v1960_v54 = vld [vmem:[#allocation8 + $0x54] sm:$0xf0]  ;;  %v1796_v56 = vor.u32 %v2012_v52, %v1795_v49  ;;  %v1994_v60 = vld [vmem:[#allocation8 + $0x164] sm:$0xf0] }
  0x48   : > { %1145 = vmatpush.bf16.msrb.mxu3 %v1668_v43  ;;  %v1651_v57 = vld [vmem:[#allocation8 + $0xd0] sm:$0xf]  ;;  %v1976_v58 = vld [vmem:[#allocation8 + $0xd4] sm:$0xf0]  ;;  %v1787_v61 = vld [vmem:[#allocation8 + $0x1e0] sm:$0xf]  ;;  %v1724_v63 = vor.u32 %v1994_v60, %v1723_v59  ;;  %v1588_v1 = vor.u32 %v1960_v54, %v1587_v53 }
  0x49   : > { %510 = vmatpush.bf16.msrb.mxu0 %v1510_v37  ;;  %v2010_v62 = vld [vmem:[#allocation8 + $0x1e4] sm:$0xf0]  ;;  %v1579_v2 = vld [vmem:[#allocation8 + $0x40] sm:$0xf]  ;;  %v1715_v3 = vld [vmem:[#allocation8 + $0x150] sm:$0xf]  ;;  %v1652_v5 = vor.u32 %v1976_v58, %v1651_v57 }
  0x4a   : > { %524 = vmatpush.bf16.msrb.mxu1 %v1514_v42  ;;  %v1788_v0 = vor.u32 %v2010_v62, %v1787_v61  ;;  %v1992_v4 = vld [vmem:[#allocation8 + $0x154] sm:$0xf0]  ;;  %v1958_v6 = vld [vmem:[#allocation8 + $0x44] sm:$0xf0]  ;;  %v1779_v7 = vld [vmem:[#allocation8 + $0x1d0] sm:$0xf] }
  0x4b   : > { %1132 = vmatpush.bf16.msrb.mxu2 %v1596_v50  ;;  %v2008_v8 = vld [vmem:[#allocation8 + $0x1d4] sm:$0xf0]  ;;  %v1643_v9 = vld [vmem:[#allocation8 + $0xc0] sm:$0xf]  ;;  %v1974_v10 = vld [vmem:[#allocation8 + $0xc4] sm:$0xf0]  ;;  %v1716_v11 = vor.u32 %v1992_v4, %v1715_v3  ;;  %v1580_v13 = vor.u32 %v1958_v6, %v1579_v2 }
  0x4c   : > { %1146 = vmatpush.bf16.msrb.mxu3 %v1660_v55  ;;  %v1780_v12 = vor.u32 %v2008_v8, %v1779_v7  ;;  %v1571_v14 = vld [vmem:[#allocation8 + $0x30] sm:$0xf]  ;;  %v1707_v15 = vld [vmem:[#allocation8 + $0x140] sm:$0xf]  ;;  %v1990_v16 = vld [vmem:[#allocation8 + $0x144] sm:$0xf0]  ;;  %v1644_v17 = vor.u32 %v1974_v10, %v1643_v9 }
  0x4d   : > { %1159 = vmatpush.bf16.msra.mxu0 %v1732_v51  ;;  %v1956_v18 = vld [vmem:[#allocation8 + $0x34] sm:$0xf0]  ;;  %v1771_v19 = vld [vmem:[#allocation8 + $0x1c0] sm:$0xf]  ;;  %v2006_v20 = vld [vmem:[#allocation8 + $0x1c4] sm:$0xf0]  ;;  %v1708_v24 = vor.u32 %v1990_v16, %v1707_v15 }
  0x4e   : > { %1173 = vmatpush.bf16.msra.mxu1 %v1796_v56  ;;  %v1635_v21 = vld [vmem:[#allocation8 + $0xb0] sm:$0xf]  ;;  %v1972_v22 = vld [vmem:[#allocation8 + $0xb4] sm:$0xf0]  ;;  %v1572_v25 = vor.u32 %v1956_v18, %v1571_v14  ;;  %v1772_v26 = vor.u32 %v2006_v20, %v1771_v19  ;;  %v1563_v27 = vld [vmem:[#allocation8 + $0x20] sm:$0xf] }
  0x4f   : > { %1133 = vmatpush.bf16.msrb.mxu2 %v1588_v1  ;;  %v1699_v28 = vld [vmem:[#allocation8 + $0x130] sm:$0xf]  ;;  %v1988_v29 = vld [vmem:[#allocation8 + $0x134] sm:$0xf0]  ;;  %v1636_v30 = vor.u32 %v1972_v22, %v1635_v21  ;;  %v1954_v31 = vld [vmem:[#allocation8 + $0x24] sm:$0xf0] }
  0x50   : > { %1147 = vmatpush.bf16.msrb.mxu3 %v1652_v5  ;;  %v1763_v32 = vld [vmem:[#allocation8 + $0x1b0] sm:$0xf]  ;;  %v2004_v33 = vld [vmem:[#allocation8 + $0x1b4] sm:$0xf0]  ;;  %v1627_v34 = vld [vmem:[#allocation8 + $0xa0] sm:$0xf]  ;;  %v1700_v36 = vor.u32 %v1988_v29, %v1699_v28  ;;  %v1564_v37 = vor.u32 %v1954_v31, %v1563_v27 }
  0x51   : > { %1160 = vmatpush.bf16.msra.mxu0 %v1724_v63  ;;  %v1970_v35 = vld [vmem:[#allocation8 + $0xa4] sm:$0xf0]  ;;  %v1764_v38 = vor.u32 %v2004_v33, %v1763_v32  ;;  %v1555_v39 = vld [vmem:[#allocation8 + $0x10] sm:$0xf]  ;;  %v1691_v40 = vld [vmem:[#allocation8 + $0x120] sm:$0xf] }
  0x52   : > { %1174 = vmatpush.bf16.msra.mxu1 %v1788_v0  ;;  %v1986_v41 = vld [vmem:[#allocation8 + $0x124] sm:$0xf0]  ;;  %v1628_v42 = vor.u32 %v1970_v35, %v1627_v34  ;;  %v1952_v43 = vld [vmem:[#allocation8 + $0x14] sm:$0xf0]  ;;  %v1755_v44 = vld [vmem:[#allocation8 + $0x1a0] sm:$0xf] }
  0x53   : > { %1134 = vmatpush.bf16.msrb.mxu2 %v1580_v13  ;;  %v2002_v45 = vld [vmem:[#allocation8 + $0x1a4] sm:$0xf0]  ;;  %v1619_v46 = vld [vmem:[#allocation8 + $0x90] sm:$0xf]  ;;  %v1968_v47 = vld [vmem:[#allocation8 + $0x94] sm:$0xf0]  ;;  %v1692_v48 = vor.u32 %v1986_v41, %v1691_v40 }
  0x54   : > { %1148 = vmatpush.bf16.msrb.mxu3 %v1644_v17  ;;  %1543 = vmatmul.msk.bf16.vlgmr.msrb.gmra.mxu0 %vm443_vm0, %v2530_v23  ;;  %v1547_v49 = vld [vmem:[#allocation8] sm:$0xf]  ;;  %v1756_v50 = vor.u32 %v2002_v45, %v1755_v44  ;;  %v1950_v51 = vld [vmem:[#allocation8 + $0x4] sm:$0xf0]  ;;  %v1683_v52 = vld [vmem:[#allocation8 + $0x110] sm:$0xf]  ;;  %v1620_v54 = vor.u32 %v1968_v47, %v1619_v46 }
  0x55   : > { %1161 = vmatpush.bf16.msra.mxu0 %v1716_v11  ;;  %1544 = vmatmul.msk.bf16.vlgmr.msrb.gmra.mxu1 %vm443_vm0, %v2530_v23  ;;  %v1556_v23 = vor.u32 %v1952_v43, %v1555_v39  ;;  %v1984_v53 = vld [vmem:[#allocation8 + $0x114] sm:$0xf0]  ;;  %v1611_v55 = vld [vmem:[#allocation8 + $0x80] sm:$0xf]  ;;  %v1747_v56 = vld [vmem:[#allocation8 + $0x190] sm:$0xf]  ;;  %v1548_v0 = vor.u32 %v1950_v51, %v1547_v49 }
  0x56   : > { %1175 = vmatpush.bf16.msra.mxu1 %v1780_v12  ;;  %v2000_v57 = vld [vmem:[#allocation8 + $0x194] sm:$0xf0]  ;;  %v1966_v58 = vld [vmem:[#allocation8 + $0x84] sm:$0xf0]  ;;  %v1859_v59 = vld [vmem:[#allocation8 + $0x270] sm:$0xf]  ;;  %v1684_v63 = vor.u32 %v1984_v53, %v1683_v52 }
  0x57   : > { %1135 = vmatpush.bf16.msrb.mxu2 %v1572_v25  ;;  %v2028_v60 = vld [vmem:[#allocation8 + $0x274] sm:$0xf0]  ;;  %v1923_v61 = vld [vmem:[#allocation8 + $0x2f0] sm:$0xf]  ;;  %v1748_v1 = vor.u32 %v2000_v57, %v1747_v56  ;;  %v1851_v2 = vld [vmem:[#allocation8 + $0x260] sm:$0xf]  ;;  %v1612_v6 = vor.u32 %v1966_v58, %v1611_v55 }
  0x58   : > { %1149 = vmatpush.bf16.msrb.mxu3 %v1636_v30  ;;  %v2044_v62 = vld [vmem:[#allocation8 + $0x2f4] sm:$0xf0]  ;;  %v1675_v3 = vld [vmem:[#allocation8 + $0x100] sm:$0xf]  ;;  %v1982_v4 = vld [vmem:[#allocation8 + $0x104] sm:$0xf0]  ;;  %v1860_v7 = vor.u32 %v2028_v60, %v1859_v59 }
  0x59   : > { %1162 = vmatpush.bf16.msra.mxu0 %v1708_v24  ;;  %v1739_v5 = vld [vmem:[#allocation8 + $0x180] sm:$0xf]  ;;  %v1998_v8 = vld [vmem:[#allocation8 + $0x184] sm:$0xf0]  ;;  %v1963_v9 = vld [vmem:[#allocation8 + $0x74] sm:$0xf]  ;;  %v1924_v11 = vor.u32 %v2044_v62, %v1923_v61  ;;  %v1676_v17 = vor.u32 %v1982_v4, %v1675_v3 }
  0x5a   : > { %1176 = vmatpush.bf16.msra.mxu1 %v1772_v26  ;;  %v1605_v10 = vld [vmem:[#allocation8 + $0x78] sm:$0xf0]  ;;  %v2026_v12 = vld [vmem:[#allocation8 + $0x264] sm:$0xf0]  ;;  %v1979_v13 = vld [vmem:[#allocation8 + $0xf4] sm:$0xf]  ;;  %v1740_v18 = vor.u32 %v1998_v8, %v1739_v5 }
  0x5b   : > { %1136 = vmatpush.bf16.msrb.mxu2 %v1564_v37  ;;  %v1669_v14 = vld [vmem:[#allocation8 + $0xf8] sm:$0xf0]  ;;  %v1915_v15 = vld [vmem:[#allocation8 + $0x2e0] sm:$0xf]  ;;  %v2042_v16 = vld [vmem:[#allocation8 + $0x2e4] sm:$0xf0]  ;;  %v1608_v19 = vor.u32 %v1963_v9, %v1605_v10  ;;  %v1852_v20 = vor.u32 %v2026_v12, %v1851_v2 }
  0x5c   : > { %1150 = vmatpush.bf16.msrb.mxu3 %v1628_v42  ;;  %v1672_v21 = vor.u32 %v1979_v13, %v1669_v14  ;;  %v1843_v22 = vld [vmem:[#allocation8 + $0x250] sm:$0xf]  ;;  %v1961_v24 = vld [vmem:[#allocation8 + $0x64] sm:$0xf]  ;;  %v1597_v25 = vld [vmem:[#allocation8 + $0x68] sm:$0xf0]  ;;  %v1916_v26 = vor.u32 %v2042_v16, %v1915_v15 }
  0x5d   : > { %1163 = vmatpush.bf16.msra.mxu0 %v1700_v36  ;;  %v2024_v27 = vld [vmem:[#allocation8 + $0x254] sm:$0xf0]  ;;  %v1977_v28 = vld [vmem:[#allocation8 + $0xe4] sm:$0xf]  ;;  %v1661_v29 = vld [vmem:[#allocation8 + $0xe8] sm:$0xf0]  ;;  %v1600_v32 = vor.u32 %v1961_v24, %v1597_v25 }
  0x5e   : > { %1177 = vmatpush.bf16.msra.mxu1 %v1764_v38  ;;  %v1907_v30 = vld [vmem:[#allocation8 + $0x2d0] sm:$0xf]  ;;  %v2040_v31 = vld [vmem:[#allocation8 + $0x2d4] sm:$0xf0]  ;;  %v1844_v33 = vor.u32 %v2024_v27, %v1843_v22  ;;  %v1664_v34 = vor.u32 %v1977_v28, %v1661_v29  ;;  %v1835_v36 = vld [vmem:[#allocation8 + $0x240] sm:$0xf] }
  0x5f   : > { %1137 = vmatpush.bf16.msrb.mxu2 %v1556_v23  ;;  %v1908_v35 = vor.u32 %v2040_v31, %v1907_v30  ;;  %v2022_v37 = vld [vmem:[#allocation8 + $0x244] sm:$0xf0]  ;;  %v1899_v38 = vld [vmem:[#allocation8 + $0x2c0] sm:$0xf]  ;;  %v1959_v42 = vld [vmem:[#allocation8 + $0x54] sm:$0xf] }
  0x60   : > { %1151 = vmatpush.bf16.msrb.mxu3 %v1620_v54  ;;  %v2038_v39 = vld [vmem:[#allocation8 + $0x2c4] sm:$0xf0]  ;;  %v1836_v40 = vor.u32 %v2022_v37, %v1835_v36  ;;  %v1589_v43 = vld [vmem:[#allocation8 + $0x58] sm:$0xf0]  ;;  %v1975_v44 = vld [vmem:[#allocation8 + $0xd4] sm:$0xf] }
  0x61   : > { %1164 = vmatpush.bf16.msra.mxu0 %v1692_v48  ;;  %v1900_v41 = vor.u32 %v2038_v39, %v1899_v38  ;;  %v1592_v45 = vor.u32 %v1959_v42, %v1589_v43  ;;  %v1653_v46 = vld [vmem:[#allocation8 + $0xd8] sm:$0xf0]  ;;  %v1827_v48 = vld [vmem:[#allocation8 + $0x230] sm:$0xf]  ;;  %v2020_v49 = vld [vmem:[#allocation8 + $0x234] sm:$0xf0] }
  0x62   : > { %1178 = vmatpush.bf16.msra.mxu1 %v1756_v50  ;;  %v1656_v47 = vor.u32 %v1975_v44, %v1653_v46  ;;  %v1891_v23 = vld [vmem:[#allocation8 + $0x2b0] sm:$0xf]  ;;  %v1828_v50 = vor.u32 %v2020_v49, %v1827_v48  ;;  %v2036_v51 = vld [vmem:[#allocation8 + $0x2b4] sm:$0xf0]  ;;  %v1957_v53 = vld [vmem:[#allocation8 + $0x44] sm:$0xf] }
  0x63   : > { %1138 = vmatpush.bf16.msrb.mxu2 %v1548_v0  ;;  %v1892_v52 = vor.u32 %v2036_v51, %v1891_v23  ;;  %v1581_v54 = vld [vmem:[#allocation8 + $0x48] sm:$0xf0]  ;;  %v1973_v55 = vld [vmem:[#allocation8 + $0xc4] sm:$0xf]  ;;  %v1819_v59 = vld [vmem:[#allocation8 + $0x220] sm:$0xf] }
  0x64   : > { %1152 = vmatpush.bf16.msrb.mxu3 %v1612_v6  ;;  %v1584_v56 = vor.u32 %v1957_v53, %v1581_v54  ;;  %v1645_v57 = vld [vmem:[#allocation8 + $0xc8] sm:$0xf0]  ;;  %v2018_v60 = vld [vmem:[#allocation8 + $0x224] sm:$0xf0]  ;;  %v1883_v61 = vld [vmem:[#allocation8 + $0x2a0] sm:$0xf] }
  0x65   : > { %1165 = vmatpush.bf16.msra.mxu0 %v1684_v63  ;;  %v1648_v58 = vor.u32 %v1973_v55, %v1645_v57  ;;  %v1820_v62 = vor.u32 %v2018_v60, %v1819_v59  ;;  %v2034_v63 = vld [vmem:[#allocation8 + $0x2a4] sm:$0xf0]  ;;  %v1573_v2 = vld [vmem:[#allocation8 + $0x38] sm:$0xf0]  ;;  %v1971_v3 = vld [vmem:[#allocation8 + $0xb4] sm:$0xf] }
  0x66   : > { %1179 = vmatpush.bf16.msra.mxu1 %v1748_v1  ;;  %v1884_v0 = vor.u32 %v2034_v63, %v1883_v61  ;;  %v1955_v1 = vld [vmem:[#allocation8 + $0x34] sm:$0xf]  ;;  %v1637_v5 = vld [vmem:[#allocation8 + $0xb8] sm:$0xf0]  ;;  %v2016_v8 = vld [vmem:[#allocation8 + $0x214] sm:$0xf0] }
  0x67   : > { %1187 = vmatpush.bf16.msra.mxu2 %v1860_v7  ;;  %v1576_v4 = vor.u32 %v1955_v1, %v1573_v2  ;;  %v1640_v6 = vor.u32 %v1971_v3, %v1637_v5  ;;  %v1811_v7 = vld [vmem:[#allocation8 + $0x210] sm:$0xf]  ;;  %v1953_v13 = vld [vmem:[#allocation8 + $0x24] sm:$0xf]  ;;  %v1565_v14 = vld [vmem:[#allocation8 + $0x28] sm:$0xf0] }
  0x68   : > { %1201 = vmatpush.bf16.msra.mxu3 %v1924_v11  ;;  %v1812_v9 = vor.u32 %v2016_v8, %v1811_v7  ;;  %v1875_v10 = vld [vmem:[#allocation8 + $0x290] sm:$0xf]  ;;  %v2032_v11 = vld [vmem:[#allocation8 + $0x294] sm:$0xf0]  ;;  %v1969_v15 = vld [vmem:[#allocation8 + $0xa4] sm:$0xf]  ;;  %v1568_v16 = vor.u32 %v1953_v13, %v1565_v14 }
  0x69   : > { %1166 = vmatpush.bf16.msra.mxu0 %v1676_v17  ;;  %v1876_v12 = vor.u32 %v2032_v11, %v1875_v10  ;;  %v1629_v17 = vld [vmem:[#allocation8 + $0xa8] sm:$0xf0]  ;;  %v2030_v24 = vld [vmem:[#allocation8 + $0x284] sm:$0xf0]  ;;  %v1557_v27 = vld [vmem:[#allocation8 + $0x18] sm:$0xf0] }
  0x6a   : > { %1180 = vmatpush.bf16.msra.mxu1 %v1740_v18  ;;  %v1632_v18 = vor.u32 %v1969_v15, %v1629_v17  ;;  %v1967_v28 = vld [vmem:[#allocation8 + $0x94] sm:$0xf]  ;;  %v1621_v30 = vld [vmem:[#allocation8 + $0x98] sm:$0xf0]  ;;  %v1993_v1 = vld [vmem:[#allocation8 + $0x164] sm:$0xf] }
  0x6b   : > { %1188 = vmatpush.bf16.msra.mxu2 %v1852_v20  ;;  %v2014_v20 = vld [vmem:[#allocation8 + $0x204] sm:$0xf0]  ;;  %v1624_v31 = vor.u32 %v1967_v28, %v1621_v30  ;;  %v2544_v38 = vld [vmem:[#allocation7] sm:$0x3f]  ;;  %v1995_v51 = vld [vmem:[#allocation8 + $0x174] sm:$0xf] }
  0x6c   : > { %1202 = vmatpush.bf16.msra.mxu3 %v1916_v26  ;;  %v1951_v26 = vld [vmem:[#allocation8 + $0x14] sm:$0xf]  ;;  %v367_v42 = vperm.slane %v2544_v38, 1  ;;  %v368_v46 = vperm.slane %v2544_v38, 2  ;;  %v369_v49 = vperm.slane %v2544_v38, 3  ;;  %v371_v28 = vperm.slane %v2544_v38, 5 }
  0x6d   : > { %1215 = vmatpush.bf16.msrb.mxu0 %v1608_v19  ;;  %v1803_v19 = vld [vmem:[#allocation8 + $0x200] sm:$0xf]  ;;  %v1560_v29 = vor.u32 %v1951_v26, %v1557_v27  ;;  %v2011_v54 = vld [vmem:[#allocation8 + $0x1f4] sm:$0xf]  ;;  %v1797_v55 = vld [vmem:[#allocation8 + $0x1f8] sm:$0xf0] }
  0x6e   : > { %1229 = vmatpush.bf16.msrb.mxu1 %v1672_v21  ;;  %v1867_v21 = vld [vmem:[#allocation8 + $0x280] sm:$0xf]  ;;  %v1804_v22 = vor.u32 %v2014_v20, %v1803_v19  ;;  %v1725_v2 = vld [vmem:[#allocation8 + $0x168] sm:$0xf0]  ;;  %v2027_v7 = vld [vmem:[#allocation8 + $0x274] sm:$0xf] }
  0x6f   : > { %1189 = vmatpush.bf16.msra.mxu2 %v1844_v33  ;;  %v1868_v25 = vor.u32 %v2030_v24, %v1867_v21  ;;  %v1549_v33 = vld [vmem:[#allocation8 + $0x8] sm:$0xf0]  ;;  %v1861_v8 = vld [vmem:[#allocation8 + $0x278] sm:$0xf0]  ;;  %v1728_v13 = vor.u32 %v1993_v1, %v1725_v2  ;;  %v2043_v14 = vld [vmem:[#allocation8 + $0x2f4] sm:$0xf] }
  0x70   : > { %1203 = vmatpush.bf16.msra.mxu3 %v1908_v35  ;;  %v1613_v35 = vld [vmem:[#allocation8 + $0x88] sm:$0xf0]  ;;  %v1925_v15 = vld [vmem:[#allocation8 + $0x2f8] sm:$0xf0]  ;;  %v1991_v20 = vld [vmem:[#allocation8 + $0x154] sm:$0xf] }
  0x71   : > { %1216 = vmatpush.bf16.msrb.mxu0 %v1600_v32  ;;  %v1949_v32 = vld [vmem:[#allocation8 + $0x4] sm:$0xf]  ;;  %v1789_v5 = vld [vmem:[#allocation8 + $0x1e8] sm:$0xf0]  ;;  %v1717_v21 = vld [vmem:[#allocation8 + $0x158] sm:$0xf0] }
  0x72   : > { %1230 = vmatpush.bf16.msrb.mxu1 %v1664_v34  ;;  %v1965_v34 = vld [vmem:[#allocation8 + $0x84] sm:$0xf]  ;;  %v1552_v36 = vor.u32 %v1949_v32, %v1549_v33  ;;  %v2007_v24 = vld [vmem:[#allocation8 + $0x1d4] sm:$0xf]  ;;  %v370_v27 = vperm.slane %v2544_v38, 4  ;;  %v1720_v32 = vor.u32 %v1991_v20, %v1717_v21  ;;  %s1486_s23 = sshll.u32 %s2511_s21, 4 }
  0x73   : > { %1190 = vmatpush.bf16.msra.mxu2 %v1836_v40  ;;  %v1616_v37 = vor.u32 %v1965_v34, %v1613_v35  ;;  %v2025_v33 = vld [vmem:[#allocation8 + $0x264] sm:$0xf]  ;;  %v1853_v34 = vld [vmem:[#allocation8 + $0x268] sm:$0xf0]  ;;  %s2046_s29 = sshll.u32 %s2421_s28, 4  ;;  %s346_s22 = scalar_lea.vmem [#allocation10], %s1486_s23 }
  0x74   : > { %1204 = vmatpush.bf16.msra.mxu3 %v1900_v41  ;;  %v366_v41 = vperm.slane %v2544_v38, 0  ;;  %v2041_v35 = vld [vmem:[#allocation8 + $0x2e4] sm:$0xf]  ;;  %v1773_v38 = vld [vmem:[#allocation8 + $0x1c8] sm:$0xf0]  ;;  %s1366_s13 = scalar_lea.hbm %s2672_s7, %s2046_s29  ;;  %s1367_s28 = sshll.u32 %s346_s22, 4  ;;  %s1368_s28 = int_to_ptr.vmem [resolvable:$true] %s1367_s28 }
  0x75   : > { %1217 = vmatpush.bf16.msrb.mxu0 %v1592_v45  ;;  %s1369_s19 = sshll.u32 %s1366_s13, 4  ;;  %s1354_s1 = scalar_lea.sflag [#allocation4], %s2511_s21  ;;  %s1370_s19 = int_to_ptr.hbm [resolvable:$true] %s1369_s19 }
  0x76   : > { %1231 = vmatpush.bf16.msrb.mxu1 %v1656_v47  ;;  %s2286_s30 = sshra.s32 %s1370_s19, 4  ;;  %s2292_s14 = scalar_lea.hbm %s2672_s7, 32  ;;  %s2287_s30 = int_to_ptr.hbm [resolvable:$true] %s2286_s30 }
  0x77   : > { %1191 = vmatpush.bf16.msra.mxu2 %v1828_v50  ;;  %s2288_s12 = scalar_lea.hbm %s2287_s30, 16  ;;  %p2293_p11 = scmp.lt.s32.totalorder %s2287_s30, %s2672_s7 }
  0x78   : > { %1205 = vmatpush.bf16.msra.mxu3 %v1892_v52  ;;  %v1733_v52 = vld [vmem:[#allocation8 + $0x178] sm:$0xf0]  ;;  %p2289_p1 = scmp.ne.s32.totalorder %s2287_s30, %s2288_s12  ;;  %p2294_p9 = scmp.lt.s32.totalorder %s2292_s14, %s2288_s12 }
  0x79   : > { %1218 = vmatpush.bf16.msrb.mxu0 %v1584_v56  ;;  %v1736_v61 = vor.u32 %v1995_v51, %v1733_v52 }
  0x7a   : > { %1232 = vmatpush.bf16.msrb.mxu1 %v1648_v58  ;;  %p2290_p4 = pnand %p2289_p1, %p2483_p7  ;;  %p2295_p2 = por %p2294_p9, %p2293_p11 }
  0x7b   : > { %1192 = vmatpush.bf16.msra.mxu2 %v1820_v62 }
  0x7c   : > { %1206 = vmatpush.bf16.msra.mxu3 %v1884_v0  ;;  %v1800_v0 = vor.u32 %v2011_v54, %v1797_v55  ;;  %v1909_v54 = vld [vmem:[#allocation8 + $0x2d8] sm:$0xf0]  ;;  %v1987_v55 = vld [vmem:[#allocation8 + $0x134] sm:$0xf]  ;;  %p2291_p8 = pneg %p2290_p4 }
  0x7d   : > { %1219 = vmatpush.bf16.msrb.mxu0 %v1576_v4  ;;  %v2009_v4 = vld [vmem:[#allocation8 + $0x1e4] sm:$0xf] }
  0x7e   : > { %1233 = vmatpush.bf16.msrb.mxu1 %v1640_v6  ;;  %v1792_v19 = vor.u32 %v2009_v4, %v1789_v5  ;;  %v2021_v4 = vld [vmem:[#allocation8 + $0x244] sm:$0xf]  ;;  %v1837_v5 = vld [vmem:[#allocation8 + $0x248] sm:$0xf0]  ;;  %p2296_p10 = pnand %p2295_p2, %p2291_p8 }
  0x7f   : > { %1193 = vmatpush.bf16.msra.mxu2 %v1812_v9 }
  0x80   : > { %1207 = vmatpush.bf16.msra.mxu3 %v1876_v12 }
  0x81   : > { %1220 = vmatpush.bf16.msrb.mxu0 %v1568_v16 }
  0x82   : > { %1234 = vmatpush.bf16.msrb.mxu1 %v1632_v18 }
  0x83   : > { %1194 = vmatpush.bf16.msra.mxu2 %v1804_v22 }
  0x84   : > { %1208 = vmatpush.bf16.msra.mxu3 %v1868_v25  ;;  %v1781_v25 = vld [vmem:[#allocation8 + $0x1d8] sm:$0xf0] }
  0x85   : > { %1221 = vmatpush.bf16.msrb.mxu0 %v1560_v29  ;;  %v1864_v29 = vor.u32 %v2027_v7, %v1861_v8 }
  0x86   : > { %1235 = vmatpush.bf16.msrb.mxu1 %v1624_v31  ;;  %v1928_v31 = vor.u32 %v2043_v14, %v1925_v15  ;;  %v2001_v14 = vld [vmem:[#allocation8 + $0x1a4] sm:$0xf]  ;;  %v1757_v15 = vld [vmem:[#allocation8 + $0x1a8] sm:$0xf0] }
  0x87   : > { %v1760_v21 = vor.u32 %v2001_v14, %v1757_v15 }
  0x89   : > { %1222 = vmatpush.bf16.msrb.mxu0 %v1552_v36 }
  0x8a   : > { %1236 = vmatpush.bf16.msrb.mxu1 %v1616_v37  ;;  %v1784_v37 = vor.u32 %v2007_v24, %v1781_v25  ;;  %v1893_v24 = vld [vmem:[#allocation8 + $0x2b8] sm:$0xf0]  ;;  %v1983_v25 = vld [vmem:[#allocation8 + $0x114] sm:$0xf] }
  0xc1   : > { %v456_v39 = vpop.f32.mrf.mxu0 }
  0xc2   : > { %v470_v40 = vpop.f32.mrf.mxu1  ;;  %v457_v43 = vadd.f32 %v456_v39, %v366_v41  ;;  %v1917_v39 = vld [vmem:[#allocation8 + $0x2e8] sm:$0xf0] }
  0xc3   : > { %v471_v45 = vadd.f32 %v470_v40, %v367_v42  ;;  %v1989_v40 = vld [vmem:[#allocation8 + $0x144] sm:$0xf] }
  0xc4   : > { %v531_v56 = vmax.f32 %v457_v43, 0.0 }
  0xc5   : > { %v532_v58 = vmax.f32 %v471_v45, 0.0 }
  0xc9   : > { %v484_v44 = vpop.f32.mrf.mxu2  ;;  %v458_v48 = vpop.f32.mrf.mxu0 }
  0xca   : > { %v498_v47 = vpop.f32.mrf.mxu3  ;;  %v459_v23 = vadd.f32 %v458_v48, %v366_v41  ;;  %v472_v50 = vpop.f32.mrf.mxu1  ;;  %v485_v59 = vadd.f32 %v484_v44, %v368_v46  ;;  %v1709_v41 = vld [vmem:[#allocation8 + $0x148] sm:$0xf0]  ;;  %v1856_v44 = vor.u32 %v2025_v33, %v1853_v34 }
  0xcb   : > { %v473_v53 = vadd.f32 %v472_v50, %v367_v42  ;;  %v499_v62 = vadd.f32 %v498_v47, %v369_v49  ;;  %v2005_v42 = vld [vmem:[#allocation8 + $0x1c4] sm:$0xf]  ;;  %v1920_v47 = vor.u32 %v2041_v35, %v1917_v39  ;;  %v1712_v48 = vor.u32 %v1989_v40, %v1709_v41  ;;  %v1821_v33 = vld [vmem:[#allocation8 + $0x228] sm:$0xf0] }
  0xcc   : > { %v537_v57 = vmax.f32 %v459_v23, 0.0  ;;  %v533_v9 = vmax.f32 %v485_v59, 0.0  ;;  %v1845_v23 = vld [vmem:[#allocation8 + $0x258] sm:$0xf0]  ;;  %v1776_v52 = vor.u32 %v2005_v42, %v1773_v38  ;;  %v1885_v39 = vld [vmem:[#allocation8 + $0x2a8] sm:$0xf0] }
  0xcd   : > { %v538_v60 = vmax.f32 %v473_v53, 0.0  ;;  %v534_v16 = vmax.f32 %v499_v62, 0.0  ;;  %v2039_v53 = vld [vmem:[#allocation8 + $0x2d4] sm:$0xf]  ;;  %v1765_v59 = vld [vmem:[#allocation8 + $0x1b8] sm:$0xf0] }
  0xce   : > { %v2550_v63 = vpack.c.bf16 %v537_v57, %v531_v56  ;;  %v1701_v57 = vld [vmem:[#allocation8 + $0x138] sm:$0xf0]  ;;  %v1912_v2 = vor.u32 %v2039_v53, %v1909_v54  ;;  %v1981_v40 = vld [vmem:[#allocation8 + $0x104] sm:$0xf]  ;;  %v1677_v41 = vld [vmem:[#allocation8 + $0x108] sm:$0xf0] }
  0xcf   : > { %v2552_v3 = vpack.c.bf16 %v538_v60, %v532_v58  ;;  %v2003_v58 = vld [vmem:[#allocation8 + $0x1b4] sm:$0xf]  ;;  %v1704_v7 = vor.u32 %v1987_v55, %v1701_v57  ;;  %v1997_v42 = vld [vmem:[#allocation8 + $0x184] sm:$0xf]  ;;  %v1741_v38 = vld [vmem:[#allocation8 + $0x188] sm:$0xf0] }
  0xd0   : > { %1139 = vmatmul.bf16.vlgmr.msrb.gmra.mxu2 %v2550_v63  ;;  %v1768_v8 = vor.u32 %v2003_v58, %v1765_v59  ;;  %v1869_v53 = vld [vmem:[#allocation8 + $0x288] sm:$0xf0] }
  0xd1   : > { %v486_v6 = vpop.f32.mrf.mxu2  ;;  %1153 = vmatmul.bf16.vlgmr.msrb.gmra.mxu3 %v2552_v3  ;;  %v512_v12 = vpop.f32.mrf.mxu0  ;;  %1243 = vmatpush.bf16.msrb.mxu2 %v1736_v61 }
  0xd2   : > { %v487_v10 = vadd.f32 %v486_v6, %v368_v46  ;;  %v500_v11 = vpop.f32.mrf.mxu3  ;;  %v526_v18 = vpop.f32.mrf.mxu1  ;;  %1257 = vmatpush.bf16.msrb.mxu3 %v1800_v0  ;;  %v513_v43 = vadd.f32 %v512_v12, %v370_v27 }
  0xd3   : > { %v501_v17 = vadd.f32 %v500_v11, %v369_v49  ;;  %v527_v45 = vadd.f32 %v526_v18, %v371_v28  ;;  %v2023_v49 = vld [vmem:[#allocation8 + $0x254] sm:$0xf]  ;;  %v1985_v11 = vld [vmem:[#allocation8 + $0x124] sm:$0xf] }
  0xd4   : > { %v539_v22 = vmax.f32 %v487_v10, 0.0  ;;  %v535_v60 = vmax.f32 %v513_v43, 0.0  ;;  %v1848_v62 = vor.u32 %v2023_v49, %v1845_v23  ;;  %v1901_v10 = vld [vmem:[#allocation8 + $0x2c8] sm:$0xf0]  ;;  %v2019_v18 = vld [vmem:[#allocation8 + $0x234] sm:$0xf] }
  0xd5   : > { %v540_v26 = vmax.f32 %v501_v17, 0.0  ;;  %1244 = vmatpush.bf16.msrb.mxu2 %v1728_v13  ;;  %v536_v0 = vmax.f32 %v527_v45, 0.0  ;;  %v1693_v13 = vld [vmem:[#allocation8 + $0x128] sm:$0xf0]  ;;  %v2015_v45 = vld [vmem:[#allocation8 + $0x214] sm:$0xf] }
  0xd6   : > { %v2558_v30 = vpack.c.bf16 %v539_v22, %v533_v9  ;;  %1258 = vmatpush.bf16.msrb.mxu3 %v1792_v19  ;;  %v2037_v9 = vld [vmem:[#allocation8 + $0x2c4] sm:$0xf]  ;;  %v1829_v19 = vld [vmem:[#allocation8 + $0x238] sm:$0xf0]  ;;  %v1696_v20 = vor.u32 %v1985_v11, %v1693_v13  ;;  %v2035_v22 = vld [vmem:[#allocation8 + $0x2b4] sm:$0xf] }
  0xd7   : > { %v2560_v36 = vpack.c.bf16 %v540_v26, %v534_v16  ;;  %v1840_v16 = vor.u32 %v2021_v4, %v1837_v5  ;;  %v1904_v17 = vor.u32 %v2037_v9, %v1901_v10  ;;  %v1685_v26 = vld [vmem:[#allocation8 + $0x118] sm:$0xf0]  ;;  %v2031_v49 = vld [vmem:[#allocation8 + $0x294] sm:$0xf]  ;;  %v2357_v4 = vmov 0  }
  0xd8   : > { %1167 = vmatmul.bf16.vlgmr.msra.gmra.mxu0 %v2558_v30  ;;  %v1688_v34 = vor.u32 %v1983_v25, %v1685_v26  ;;  %v1877_v23 = vld [vmem:[#allocation8 + $0x298] sm:$0xf0] }
  0xd9   : > { %1181 = vmatmul.bf16.vlgmr.msra.gmra.mxu1 %v2560_v36  ;;  %1271 = vmatpush.bf16.msra.mxu0 %v1864_v29  ;;  %v514_v46 = vpop.f32.mrf.mxu0  ;;  %v1832_v29 = vor.u32 %v2019_v18, %v1829_v19 }
  0xda   : > { %1285 = vmatpush.bf16.msra.mxu1 %v1928_v31  ;;  %1245 = vmatpush.bf16.msrb.mxu2 %v1720_v32  ;;  %v515_v50 = vadd.f32 %v514_v46, %v370_v27  ;;  %v528_v51 = vpop.f32.mrf.mxu1  ;;  %v1999_v27 = vld [vmem:[#allocation8 + $0x194] sm:$0xf]  ;;  %v1896_v31 = vor.u32 %v2035_v22, %v1893_v24  ;;  %v2017_v32 = vld [vmem:[#allocation8 + $0x224] sm:$0xf]  ;;  %v1813_v46 = vld [vmem:[#allocation8 + $0x218] sm:$0xf0] }
  0xdb   : > { %1259 = vmatpush.bf16.msrb.mxu3 %v1784_v37  ;;  %v529_v56 = vadd.f32 %v528_v51, %v371_v28  ;;  %v1749_v28 = vld [vmem:[#allocation8 + $0x198] sm:$0xf0]  ;;  %v2033_v37 = vld [vmem:[#allocation8 + $0x2a4] sm:$0xf]  ;;  %v1824_v43 = vor.u32 %v2017_v32, %v1821_v33 }
  0xdc   : > { %v541_v61 = vmax.f32 %v515_v50, 0.0  ;;  %v1752_v35 = vor.u32 %v1999_v27, %v1749_v28  ;;  %v1816_v50 = vor.u32 %v2015_v45, %v1813_v46  ;;  %v2013_v51 = vld [vmem:[#allocation8 + $0x204] sm:$0xf]  ;;  %v1301_v46 = vld [vmem:[%s2671_s6] sm:$0x1] }
  0xdd   : > { %1272 = vmatpush.bf16.msra.mxu0 %v1856_v44  ;;  %v542_v1 = vmax.f32 %v529_v56, 0.0  ;;  %v1888_v44 = vor.u32 %v2033_v37, %v1885_v39  ;;  %v2579_v56 = vld [vmem:[%s2669_s4] sm:$0x3]  ;;  %vm1302_vm3 = vcmp.gt.f32.partialorder %v1301_v46, 0.5 }
  0xde   : > { %1286 = vmatpush.bf16.msra.mxu1 %v1920_v47  ;;  %1246 = vmatpush.bf16.msrb.mxu2 %v1712_v48  ;;  %v2564_v6 = vpack.c.bf16 %v541_v61, %v535_v60  ;;  %v1680_v47 = vor.u32 %v1981_v40, %v1677_v41  ;;  %v1744_v48 = vor.u32 %v1997_v42, %v1741_v38  ;;  %v647_v57 = vperm.slane %v2579_v56, 0 }
  0xdf   : > { %1260 = vmatpush.bf16.msrb.mxu3 %v1776_v52  ;;  %v2566_v12 = vpack.c.bf16 %v542_v1, %v536_v0  ;;  %v1805_v52 = vld [vmem:[#allocation8 + $0x208] sm:$0xf0]  ;;  %v648_v38 = vperm.slane %v2579_v56, 1 }
  0xe0   : > { %1195 = vmatmul.bf16.vlgmr.msra.gmra.mxu2 %v2564_v6  ;;  %v1808_v54 = vor.u32 %v2013_v51, %v1805_v52 }
  0xe1   : > { %1273 = vmatpush.bf16.msra.mxu0 %v1848_v62  ;;  %1209 = vmatmul.bf16.vlgmr.msra.gmra.mxu3 %v2566_v12 }
  0xe2   : > { %1287 = vmatpush.bf16.msra.mxu1 %v1912_v2  ;;  %1247 = vmatpush.bf16.msrb.mxu2 %v1704_v7 }
  0xe3   : > { %1261 = vmatpush.bf16.msrb.mxu3 %v1768_v8 }
  0xe5   : > { %1274 = vmatpush.bf16.msra.mxu0 %v1840_v16 }
  0xe6   : > { %1288 = vmatpush.bf16.msra.mxu1 %v1904_v17  ;;  %1248 = vmatpush.bf16.msrb.mxu2 %v1696_v20 }
  0xe7   : > { %1262 = vmatpush.bf16.msrb.mxu3 %v1760_v21 }
  0xe8   : > { %1223 = vmatmul.bf16.vlgmr.msrb.gmra.mxu0 %v2550_v63  ;;  %v1880_v63 = vor.u32 %v2031_v49, %v1877_v23 }
  0xe9   : > { %1237 = vmatmul.bf16.vlgmr.msrb.gmra.mxu1 %v2552_v3  ;;  %1275 = vmatpush.bf16.msra.mxu0 %v1832_v29  ;;  %v2029_v3 = vld [vmem:[#allocation8 + $0x284] sm:$0xf] }
  0xea   : > { %1289 = vmatpush.bf16.msra.mxu1 %v1896_v31  ;;  %1249 = vmatpush.bf16.msrb.mxu2 %v1688_v34  ;;  %v1872_v55 = vor.u32 %v2029_v3, %v1869_v53 }
  0xeb   : > { %1263 = vmatpush.bf16.msrb.mxu3 %v1752_v35 }
  0xed   : > { %1276 = vmatpush.bf16.msra.mxu0 %v1824_v43 }
  0xee   : > { %1290 = vmatpush.bf16.msra.mxu1 %v1888_v44  ;;  %1250 = vmatpush.bf16.msrb.mxu2 %v1680_v47 }
  0xef   : > { %1264 = vmatpush.bf16.msrb.mxu3 %v1744_v48 }
  0xf1   : > { %1277 = vmatpush.bf16.msra.mxu0 %v1816_v50  ;;  %1251 = vmatmul.bf16.vlgmr.msrb.gmra.mxu2 %v2558_v30  ;;  %v1299_v30 = vld [vmem:[%s2670_s5] sm:$0x1] }
  0xf2   : > { %1291 = vmatpush.bf16.msra.mxu1 %v1880_v63  ;;  %1265 = vmatmul.bf16.vlgmr.msrb.gmra.mxu3 %v2560_v36  ;;  %vm1300_vm1 = vcmp.gt.f32.partialorder %v1299_v30, 0.5  ;;  %v1338_v63 = vsel %vm1302_vm3, 1, %v2357_v4 }
  0xf3   : > { %v1303_v5 = vsel %vm1300_vm1, 1, %v2357_v4 }
  0xf4   : > { %v1304_v7 = vperm.slane %v1303_v5, 0 }
  0xf5   : > { %1278 = vmatpush.bf16.msra.mxu0 %v1808_v54 }
  0xf6   : > { %1292 = vmatpush.bf16.msra.mxu1 %v1872_v55  ;;  %vm2585_vm2 = vcmp.eq.s32.totalorder %v1304_v7, 1  ;;  %v1339_v55 = vperm.slane %v1338_v63, 0 }
  0xf8   : > { %1279 = vmatmul.bf16.vlgmr.msra.gmra.mxu0 %v2564_v6  ;;  %vm2615_vm5 = vcmp.eq.s32.totalorder %v1339_v55, 1 }
  0xf9   : > { %1293 = vmatmul.bf16.vlgmr.msra.gmra.mxu1 %v2566_v12 }
 0x153   : > { %v1140_v58 = vpop.f32.mrf.mxu2 }
 0x154   : > { %v1154_v59 = vpop.f32.mrf.mxu3  ;;  %v1141_v60 = vadd.f32 %v1140_v58, %v647_v57 }
 0x155   : > { %v1168_v61 = vpop.f32.mrf.mxu0 }
 0x156   : > { %v1155_v36 = vadd.f32 %v1154_v59, %v1141_v60  ;;  %v1182_v6 = vpop.f32.mrf.mxu1 }
 0x158   : > { %v1169_v1 = vadd.f32 %v1168_v61, %v1155_v36 }
 0x15a   : > { %v1183_v8 = vadd.f32 %v1182_v6, %v1169_v1 }
 0x15b   : > { %v1142_v62 = vpop.f32.mrf.mxu2 }
 0x15c   : > { %v1156_v0 = vpop.f32.mrf.mxu3  ;;  %v1143_v2 = vadd.f32 %v1142_v62, %v647_v57 }
 0x15d   : > { %v1170_v13 = vpop.f32.mrf.mxu0 }
 0x15e   : > { %v1157_v9 = vadd.f32 %v1156_v0, %v1143_v2  ;;  %v1184_v18 = vpop.f32.mrf.mxu1 }
 0x160   : > { %v1171_v15 = vadd.f32 %v1170_v13, %v1157_v9 }
 0x162   : > { %v1185_v19 = vadd.f32 %v1184_v18, %v1171_v15 }
 0x163   : > { %v1196_v10 = vpop.f32.mrf.mxu2 }
 0x164   : > { %v1197_v11 = vadd.f32 %v1196_v10, %v1183_v8  ;;  %v1210_v12 = vpop.f32.mrf.mxu3 }
 0x165   : > { %v1224_v41 = vpop.f32.mrf.mxu0 }
 0x166   : > { %v2589_v16 = vadd.f32 %v1210_v12, %v1197_v11  ;;  %v1238_v42 = vpop.f32.mrf.mxu1  ;;  %v1225_v43 = vadd.f32 %v1224_v41, %v648_v38 }
 0x168   : > { %v1306_v17 = vsel %vm2585_vm2, %v2589_v16, -inf  ;;  %v1239_v47 = vadd.f32 %v1238_v42, %v1225_v43  ;;  %v1332_v57 = vadd.f32 1.000001, %v2589_v16  ;;  %vm1330_vm4 = vcmp.gt.f32.partialorder %v2589_v16, 0.0 }
 0x169   : > { %1308 = vmax.xlane.f32.xlu0 %v1306_v17 }
 0x16b   : > { %v1198_v20 = vpop.f32.mrf.mxu2 }
 0x16c   : > { %v1199_v21 = vadd.f32 %v1198_v20, %v1185_v19  ;;  %v1212_v22 = vpop.f32.mrf.mxu3 }
 0x16d   : > { %v1226_v44 = vpop.f32.mrf.mxu0 }
 0x16e   : > { %v2594_v24 = vadd.f32 %v1212_v22, %v1199_v21  ;;  %v1240_v48 = vpop.f32.mrf.mxu1  ;;  %v1227_v50 = vadd.f32 %v1226_v44, %v648_v38 }
 0x170   : > { %v1307_v25 = vsel %vm2585_vm2, %v2594_v24, -inf  ;;  %v1241_v56 = vadd.f32 %v1240_v48, %v1227_v50  ;;  %v1333_v9 = vadd.f32 1.000001, %v2594_v24  ;;  %vm1331_vm6 = vcmp.gt.f32.partialorder %v2594_v24, 0.0 }
 0x171   : > { %1310 = vmax.xlane.f32.xlu0 %v1307_v25 }
 0x174   : > { %v1252_v45 = vpop.f32.mrf.mxu2 }
 0x175   : > { %v1253_v49 = vadd.f32 %v1252_v45, %v1239_v47  ;;  %v1266_v23 = vpop.f32.mrf.mxu3  ;;  %v1280_v3 = vpop.f32.mrf.mxu0 }
 0x176   : > { %v1294_v60 = vpop.f32.mrf.mxu1 }
 0x177   : > { %v1267_v52 = vadd.f32 %v1266_v23, %v1253_v49 }
 0x179   : > { %v1281_v58 = vadd.f32 %v1280_v3, %v1267_v52 }
 0x17b   : > { %v1295_v2 = vadd.f32 %v1294_v60, %v1281_v58 }
 0x17c   : > { %v1254_v53 = vpop.f32.mrf.mxu2 }
 0x17d   : > { %v1255_v59 = vadd.f32 %v1254_v53, %v1241_v56  ;;  %v1268_v62 = vpop.f32.mrf.mxu3  ;;  %v1282_v10 = vpop.f32.mrf.mxu0 }
 0x17e   : > { %v1296_v15 = vpop.f32.mrf.mxu1 }
 0x17f   : > { %v1269_v4 = vadd.f32 %v1268_v62, %v1255_v59 }
 0x181   : > { %v1283_v11 = vadd.f32 %v1282_v10, %v1269_v4 }
 0x183   : > { %v1297_v17 = vadd.f32 %v1296_v15, %v1283_v11 }
 0x1dc   : > { %v1309_v26 = vpop.xlane.xlu0 %1308 }
 0x1dd   : > { %v1312_v27 = vsel %vm2585_vm2, %v1309_v26, 0.0 }
 0x1de   : > { %v1314_v28 = vsub.f32 %v2589_v16, %v1312_v27 }
 0x1e0   : > { %v1316_v29 = vmul.f32 1.442695, %v1314_v28 }
 0x1e2   : > { %2144 = vpow2.f32 %v1316_v29 }
 0x1e4   : > { %v1311_v31 = vpop.xlane.xlu0 %1310 }
 0x1e5   : > { %v1313_v32 = vsel %vm2585_vm2, %v1311_v31, 0.0 }
 0x1e6   : > { %v1315_v33 = vsub.f32 %v2594_v24, %v1313_v32 }
 0x1e8   : > { %v2145_v34 = vpop.eup %2144  ;;  %v1318_v35 = vmul.f32 1.442695, %v1315_v33 }
 0x1e9   : > { %v1320_v37 = vsel %vm2585_vm2, %v2145_v34, 0.0  ;;  %v1334_v54 = vadd.f32 1e-06, %v2145_v34 }
 0x1ea   : > { %2146 = vpow2.f32 %v1318_v35  ;;  %1322 = vadd.xlane.f32.xlu1 %v1320_v37 }
 0x1eb   : > { %v1336_v30 = vsel %vm1330_vm4, %v1332_v57, %v1334_v54 }
 0x1ec   : > { %v1341_v5 = vsel %vm2615_vm5, %v1336_v30, %v2589_v16 }
 0x1f0   : > { %v2147_v39 = vpop.eup %2146 }
 0x1f1   : > { %v1321_v40 = vsel %vm2585_vm2, %v2147_v39, 0.0  ;;  %v1335_v6 = vadd.f32 1e-06, %v2147_v39 }
 0x1f2   : > { %1324 = vadd.xlane.f32.xlu1 %v1321_v40 }
 0x1f3   : > { %v1337_v12 = vsel %vm1331_vm6, %v1333_v9, %v1335_v6 }
 0x1f4   : > { %v1342_v18 = vsel %vm2615_vm5, %v1337_v12, %v2594_v24 }
 0x25d   : > { %v1323_v51 = vpop.xlane.xlu1 %1322 }
 0x25e   : > { %2148 = vrcp.f32 %v1323_v51 }
 0x264   : > { %v2149_v61 = vpop.eup %2148 }
 0x265   : > { %v1328_v0 = vmul.f32 %v2149_v61, %v2145_v34  ;;  %v1325_v1 = vpop.xlane.xlu1 %1324 }
 0x266   : > { %2150 = vrcp.f32 %v1325_v1 }
 0x267   : > { %v1343_v7 = vsel %vm2585_vm2, %v1328_v0, %v1341_v5 }
 0x268   : > { %v2050_v8 = vpack.c.bf16 %v1295_v2, %v1343_v7 }
 0x26a   : > { %2051 = vst [vmem:[%s346_s22] sm:$0xff] %v2050_v8  }
 0x26c   : > { %v2151_v13 = vpop.eup %2150 }
 0x26d   : > { %v1329_v16 = vmul.f32 %v2151_v13, %v2147_v39 }
 0x26f   : > { %v1344_v19 = vsel %vm2585_vm2, %v1329_v16, %v1342_v18 }
 0x270   : > { %v2055_v20 = vpack.c.bf16 %v1297_v17, %v1344_v19 }
 0x272   : > { %2057 = vst [vmem:[%s346_s22 + $0x8] sm:$0xff] %v2055_v20  }
 0x273   : > { %2299 = shalt.err (!%p2296_p10)
}
 0x274   : > { %s2358_s21 = smov 128   ;;  %s2359_s29 = smov 8  }
 0x275   : > { %2072 = dma.vmem_to_hbm [thread:$0]  (%p2483_p7), %s1368_s28, 256, %s1370_s19, %s1354_s1, %s2358_s21, %s2358_s21, %s2359_s29  }
 0x276 PF: > { %s1384_s9 = sand.u32 1, %s2334_s24   ;;  %p2685_p12 = scmp.ge.s32.totalorder %s2346_s27, 2 }
 0x277   : > { %s1385_s15 = scalar_lea.sflag [#allocation4], %s1384_s9 }
 0x278   : > { %p2089_p13 = pnand %p2685_p12, %p2435_p6 }
 0x27a   : > { %p2090_p0 = pneg %p2089_p13 }
 0x27c   : > { %2329 = dma.done.wait (%p2090_p0), %s1385_s15, 256  }
 0x27d   : > { %2331 = vsyncadd (%p2090_p0), %s1385_s15, 4294967040  ;;  %p22_p3 = scmp.ge.s32.totalorder %s2469_s16, 4   ;;  %s2686_s24 = smov %s2338_s25 }
 0x27e   : > { %s2687_s25 = smov %s2342_s26  ;;  %s2688_s26 = smov %s2479_s18 }
 0x27f   : > { %s2689_s27 = smov %s2469_s16  ;;  %24 = sbr.rel (!%p22_p3) target bundleno = 9 (0x9), region = 105 }
 0x284   :  { %1391 = vsyncpa [#allocation3], 1 }
 0x285   :  { %1393 = vsyncpa [#allocation3 + $0x1], 1 }
 0x286   :  { %1394 = vsyncpa [#allocation6], 1 }
 0x287   :  { %1395 = vsyncpa [#allocation9], 1 }
 0x288   :  { %1396 = vsyncpa [#allocation4], 1 }
 0x289   :  { %1398 = vsyncpa [#allocation4 + $0x1], 1 }

</bundles_post_ra>
